<compile_context>
chip_gen: v7x
topology: tpu7x:2x2x1
jax: 0.10.0
libtpu: 0.0.40
codegen_flags: <defaults>
</compile_context>

<pallas_src>
import functools

import jax
import jax.numpy as jnp
from jax.experimental import pallas as pl
from jax.experimental.pallas import tpu as pltpu


def _round_up(x, m):
    return ((x + m - 1) // m) * m


def _similarity_kernel(x_ref, yT_ref, xinv_ref, yinv_ref, o_ref, *,
                       inv_temp, inv_eps):
    # x_ref:    (tm, H)  tile of x rows (input dtype, e.g. bf16 or f32)
    # yT_ref:   (H, tn)  tile of pre-transposed y (MXU rhs already (K, N))
    # xinv_ref: (tm, 1)  precomputed f32 1/||x_i||
    # yinv_ref: (1, tn)  precomputed f32 1/||y_j||
    # o_ref:    (tm, tn) output tile, f32
    dots = jnp.dot(x_ref[...], yT_ref[...],
                   preferred_element_type=jnp.float32)          # MXU, f32 acc

    # 1 / max(||x||*||y||, eps) == min(1/||x|| * 1/||y||, 1/eps) for norms >= 0.
    scale = jnp.minimum(xinv_ref[...] * yinv_ref[...], inv_eps)  # (tm, tn)
    o_ref[...] = (dots * (scale * inv_temp)).astype(o_ref.dtype)


def similarity(x, y, temp, *, eps=1e-8, tm=None, tn=None):
    """Pairwise cosine similarity divided by temp.

    x: (M, 1, H) or (M, H); y: (1, N, H) or (N, H).  Returns (M, N) float32.
    """
    if x.ndim == 3:
        x = jnp.squeeze(x, axis=1)
    if y.ndim == 3:
        y = jnp.squeeze(y, axis=0)
    M, H = x.shape
    N, H2 = y.shape
    assert H == H2

    # Pad N to a multiple of 128 so output (and yT) tiles are lane-dense.
    # Padded y rows are zero -> zero norm -> clamped scale, zero dots; the
    # padded columns are sliced off at the end.
    N_pad = _round_up(N, 128)
    if N_pad != N:
        y = jnp.pad(y, ((0, N_pad - N), (0, 0)))

    # Plain-JAX glue, done once outside the grid loop:
    #   * lane-dense MXU rhs: y^T with shape (H, N_pad)
    #   * exact inverse L2 norms of x rows (M,1) and y rows (1,N_pad), f32.
    yT = jnp.swapaxes(y, 0, 1)
    xf = x.astype(jnp.float32)
    yf = y.astype(jnp.float32)
    x_inv = 1.0 / jnp.sqrt(jnp.sum(xf * xf, axis=-1, keepdims=True))   # (M, 1)
    y_inv = 1.0 / jnp.sqrt(jnp.sum(yf * yf, axis=-1))[None, :]         # (1, N_pad)

    # Tile defaults: full dims when small (always legal), otherwise large
    # aligned tiles (tm multiple of 8, tn multiple of 128) to amortize the
    # ~0.35us/step overhead while staying within the v7x 64 MiB VMEM budget.
    tm_auto = tm is None
    tn_auto = tn is None
    if tm_auto:
        tm = M if M <= 512 else 512
    if tn_auto:
        tn = N_pad if N_pad <= 1024 else 1024

    # v7x has 2 TensorCores: guarantee >= 2 parallel tiles when possible so
    # the second core is not idle (negligible cost on single-TC v5e/v6e).
    if (tm_auto or tn_auto) and pl.cdiv(M, tm) * pl.cdiv(N_pad, tn) < 2:
        if tn_auto and N_pad >= 256:
            tn = _round_up(N_pad // 2, 128)
        elif tm_auto and M >= 16:
            tm = _round_up(pl.cdiv(M, 2), 8)

    gi = pl.cdiv(M, tm)
    gj = pl.cdiv(N_pad, tn)

    # Grid order: the operand whose block index varies with the *inner* axis is
    # fully re-streamed once per outer step.  Pick the order that minimizes
    # redundant HBM traffic (matters in the bandwidth-bound large-M/N regime).
    in_bytes = x.dtype.itemsize
    traffic_i_outer = M * H * in_bytes + gi * N_pad * H * in_bytes   # yT re-read gi times
    traffic_j_outer = N_pad * H * in_bytes + gj * M * H * in_bytes   # x  re-read gj times
    if traffic_i_outer <= traffic_j_outer:
        grid = (gi, gj)
        i_of = lambda a, b: a
        j_of = lambda a, b: b
    else:
        grid = (gj, gi)
        i_of = lambda a, b: b
        j_of = lambda a, b: a

    in_specs = [
        pl.BlockSpec((tm, H), lambda a, b: (i_of(a, b), 0)),   # x row tile
        pl.BlockSpec((H, tn), lambda a, b: (0, j_of(a, b))),   # y^T column tile
        pl.BlockSpec((tm, 1), lambda a, b: (i_of(a, b), 0)),   # 1/||x|| tile
        pl.BlockSpec((1, tn), lambda a, b: (0, j_of(a, b))),   # 1/||y|| tile
    ]
    out_spec = pl.BlockSpec((tm, tn), lambda a, b: (i_of(a, b), j_of(a, b)))

    # VMEM budget: double-buffered input tiles + double-buffered output tile +
    # norm vectors, plus headroom.  Stays well under v7x's 64 MiB per TC.
    footprint = (2 * (tm * H + H * tn) * in_bytes
                 + 2 * tm * tn * 4
                 + 2 * (tm + tn) * 4)
    vmem_limit = int(min(64 << 20, max(int(1.5 * footprint) + (4 << 20), 8 << 20)))

    kernel = functools.partial(
        _similarity_kernel,
        inv_temp=1.0 / float(temp),
        inv_eps=1.0 / float(eps))

    out = pl.pallas_call(
        kernel,
        out_shape=jax.ShapeDtypeStruct((M, N_pad), jnp.float32),
        grid_spec=pltpu.PrefetchScalarGridSpec(
            num_scalar_prefetch=0,
            grid=grid,
            in_specs=in_specs,
            out_specs=out_spec,
        ),
        compiler_params=pltpu.CompilerParams(
            dimension_semantics=("parallel", "parallel"),
            vmem_limit_bytes=vmem_limit,
        ),
    )(x, yT, x_inv, y_inv)

    if N_pad != N:
        out = out[:, :N]
    return out


def _reference(x, y, temp, eps=1e-8):
    xs = jnp.squeeze(x, 1) if x.ndim == 3 else x
    ys = jnp.squeeze(y, 0) if y.ndim == 3 else y
    dots = xs @ ys.T
    denom = jnp.maximum(
        jnp.linalg.norm(xs, axis=-1, keepdims=True)
        * jnp.linalg.norm(ys, axis=-1, keepdims=True).T,
        eps,
    )
    return dots / denom / temp


if __name__ == "__main__":
    key = jax.random.PRNGKey(0)
    kx, ky, kx2, ky2 = jax.random.split(key, 4)

    temp = 0.05  # SimCSE default temperature

    # Test 1: SimCSE-style broadcast shapes x (M, 1, H), y (1, N, H).
    M, N, H = 8, 8, 32
    x = jax.random.normal(kx, (M, 1, H), dtype=jnp.float32)
    y = jax.random.normal(ky, (1, N, H), dtype=jnp.float32)

    out = jax.block_until_ready(similarity(x, y, temp))
    ref = _reference(x, y, temp)
    assert out.shape == (M, N)
    assert jnp.allclose(out, ref, atol=1e-4, rtol=1e-4), (
        f"max abs err {jnp.max(jnp.abs(out - ref))}")

    # Test 2: non-128-aligned N exercising padding + multi-tile parallel grid.
    M2, N2, H2 = 48, 200, 64
    x2 = jax.random.normal(kx2, (M2, H2), dtype=jnp.float32)
    y2 = jax.random.normal(ky2, (N2, H2), dtype=jnp.float32)

    out2 = jax.block_until_ready(similarity(x2, y2, temp))
    ref2 = _reference(x2, y2, temp)
    assert out2.shape == (M2, N2)
    assert jnp.allclose(out2, ref2, atol=1e-3, rtol=1e-3), (
        f"max abs err {jnp.max(jnp.abs(out2 - ref2))}")

    print("KERNEL_OK")
</pallas_src>

<mosaic_0001>
module attributes {stable_mosaic.version = 11 : i64} {
  func.func @_similarity_kernel(%arg0: i32, %arg1: i32, %arg2: memref<8x32xf32, #tpu.memory_space<vmem>>, %arg3: memref<32x128xf32, #tpu.memory_space<vmem>>, %arg4: memref<8x1xf32, #tpu.memory_space<vmem>>, %arg5: memref<1x128xf32, #tpu.memory_space<vmem>>, %arg6: memref<8x128xf32, #tpu.memory_space<vmem>>) attributes {dimension_semantics = [#tpu.dimension_semantics<parallel>, #tpu.dimension_semantics<parallel>], iteration_bounds = array<i64: 1, 1>, scalar_prefetch = 0 : i64, scratch_operands = 0 : i64, tpu.core_type = #tpu.core_type<tc>, window_params = [{transform_indices = @transform_0, window_bounds = array<i64: 8, 32>}, {transform_indices = @transform_1, window_bounds = array<i64: 32, 128>}, {transform_indices = @transform_2, window_bounds = array<i64: 8, 1>}, {transform_indices = @transform_3, window_bounds = array<i64: 1, 128>}, {transform_indices = @transform_4, window_bounds = array<i64: 8, 128>}]} {
    %c0 = arith.constant 0 : index
    %c0_0 = arith.constant 0 : index
    %0 = vector.load %arg2[%c0, %c0_0] : memref<8x32xf32, #tpu.memory_space<vmem>>, vector<8x32xf32>
    %c0_1 = arith.constant 0 : index
    %c0_2 = arith.constant 0 : index
    %1 = vector.load %arg3[%c0_1, %c0_2] : memref<32x128xf32, #tpu.memory_space<vmem>>, vector<32x128xf32>
    %cst = arith.constant dense<0.000000e+00> : vector<8x128xf32>
    %2 = tpu.matmul %0, %1, %cst {dimension_numbers = #tpu.dot_dimension_numbers<[1], [0], [0], [1], [0, 0, 1, 1], [], []>} : vector<8x32xf32>, vector<32x128xf32>, vector<8x128xf32> -> vector<8x128xf32>
    %c0_3 = arith.constant 0 : index
    %c0_4 = arith.constant 0 : index
    %3 = vector.load %arg4[%c0_3, %c0_4] : memref<8x1xf32, #tpu.memory_space<vmem>>, vector<8x1xf32>
    %c0_5 = arith.constant 0 : index
    %c0_6 = arith.constant 0 : index
    %4 = vector.load %arg5[%c0_5, %c0_6] : memref<1x128xf32, #tpu.memory_space<vmem>>, vector<1x128xf32>
    %5 = vector.broadcast %3 : vector<8x1xf32> to vector<8x128xf32>
    %6 = vector.broadcast %4 : vector<1x128xf32> to vector<8x128xf32>
    %7 = arith.mulf %5, %6 : vector<8x128xf32>
    %cst_7 = arith.constant 1.000000e+08 : f32
    %8 = vector.broadcast %cst_7 : f32 to vector<8x128xf32>
    %9 = arith.minimumf %7, %8 : vector<8x128xf32>
    %cst_8 = arith.constant 2.000000e+01 : f32
    %10 = vector.broadcast %cst_8 : f32 to vector<8x128xf32>
    %11 = arith.mulf %9, %10 : vector<8x128xf32>
    %12 = arith.mulf %2, %11 : vector<8x128xf32>
    %c0_9 = arith.constant 0 : index
    %c0_10 = arith.constant 0 : index
    %13 = vector.load %arg6[%c0_9, %c0_10] : memref<8x128xf32, #tpu.memory_space<vmem>>, vector<8x128xf32>
    tpu.vector_store %arg6[%c0_9, %c0_10], %12 {strides = array<i32>} : memref<8x128xf32, #tpu.memory_space<vmem>>, vector<8x128xf32>,
    return
  }
  func.func @transform_0(%arg0: i32, %arg1: i32) -> (i32, i32) {
    %c0_i32 = arith.constant 0 : i32
    %c0_i32_0 = arith.constant 0 : i32
    return %arg0, %c0_i32 : i32, i32
  }
  func.func @transform_1(%arg0: i32, %arg1: i32) -> (i32, i32) {
    %c0_i32 = arith.constant 0 : i32
    %c0_i32_0 = arith.constant 0 : i32
    return %c0_i32, %arg1 : i32, i32
  }
  func.func @transform_2(%arg0: i32, %arg1: i32) -> (i32, i32) {
    %c0_i32 = arith.constant 0 : i32
    %c0_i32_0 = arith.constant 0 : i32
    return %arg0, %c0_i32 : i32, i32
  }
  func.func @transform_3(%arg0: i32, %arg1: i32) -> (i32, i32) {
    %c0_i32 = arith.constant 0 : i32
    %c0_i32_0 = arith.constant 0 : i32
    return %c0_i32, %arg1 : i32, i32
  }
  func.func @transform_4(%arg0: i32, %arg1: i32) -> (i32, i32) {
    %c0_i32 = arith.constant 0 : i32
    return %arg0, %arg1 : i32, i32
  }
}

</mosaic_0001>

<bundles_post_ra>
// kernel: tpu_custom_call.1
= control target key start
LH: loop header
LB: loop body
LE: loop exit
PB: predicated region body
PF: predicated region fallthrough
CT: control target
= control target key end

     0   :  { %9 = vsyncpa [#allocation3], 0  ;;  %s291_s0 = inlined_call_operand.vmem [shape: f32[8,32], index: 0, kind: input, shape index: {}]   ;;  %s292_s1 = inlined_call_operand.hbm [shape: f32[32,128], index: 1, kind: input, shape index: {}]   ;;  %s293_s2 = inlined_call_operand.vmem [shape: f32[8,1], index: 2, kind: input, shape index: {}]   ;;  %s294_s3 = inlined_call_operand.vmem [shape: f32[1,128], index: 3, kind: input, shape index: {}]   ;;  %s295_s4 = inlined_call_operand.hbm [shape: f32[8,128], index: 4, kind: output, shape index: {}]  }
   0x1   :  { %10 = vsyncpa [#allocation4], 0  ;;  %s225_s15 = smov [#allocation2]   ;;  %s177_s19 = scalar_lea.hbm %s292_s1, 512 }
   0x2   :  { %s18_s16 = sshll.u32 %s225_s15, 4  ;;  %p178_p0 = scmp.ne.s32.totalorder %s292_s1, %s177_s19  ;;  %s19_s16 = int_to_ptr.vmem [resolvable:$true] %s18_s16 }
   0x3   :  { %p181_p1 = scmp.lt.u32.totalorder %s177_s19, %s292_s1 }
   0x5   :  { %p183_p2 = pnand %p181_p1, %p178_p0 }
   0x7   :  { %186 = shalt.err (!%p183_p2)
}
   0x8   :  { %s187_s24 = scalar_lea.vmem %s19_s16, 512  ;;  %p192_p4 = scmp.lt.s32.totalorder %s19_s16, %s19_s16 }
   0x9   :  { %p188_p3 = scmp.ne.s32.totalorder %s19_s16, %s187_s24  ;;  %p193_p5 = scmp.lt.s32.totalorder %s187_s24, %s187_s24 }
   0xb   :  { %p194_p6 = por %p193_p5, %p192_p4 }
   0xd   :  { %p195_p7 = pnand %p194_p6, %p188_p3 }
   0xf   :  { %198 = shalt.err (!%p195_p7)
}
  0x10   :  { %s226_s25 = smov 128   ;;  %s227_s26 = smov 8  }
  0x11   :  { %24 = dma.hbm_to_vmem [thread:$0]  %s292_s1, 512, %s19_s16, [#allocation3], %s226_s25, %s226_s25, %s227_s26  }
  0x12   :  { %221 = dma.done.wait [#allocation3], 512  }
  0x13   :  { %222 = vsyncadd [#allocation3], 4294966784  ;;  %v228_v0 = vmov 0.0|0.0   ;;  %vm229_vm0 = vmmov 0   ;;  %v230_v1 = vmov 0.0   ;;  %v231_v2 = vmov 0  }
  0x14   :  { %162 = vmatprep.subr.bf16.mxu0 %v228_v0  ;;  %159 = vmatprep.mubr.msk.f32.mxu0 %vm229_vm0, %v230_v1  ;;  %v33_v3 = vld [vmem:[#allocation2] sm:$0xff]  ;;  %v34_v4 = vld [vmem:[#allocation2 + $0x8] sm:$0xff]  ;;  %v35_v5 = vld [vmem:[#allocation2 + $0x10] sm:$0xff]  ;;  %vm37_vm1 = vcmask 261120  }
  0x15   :  { %176 = vset.pattern.permute.xlu0 %v231_v2  ;;  %v163_v6 = vpack.c.bf16 %v34_v4, %v33_v3  ;;  %v36_v7 = vld [vmem:[#allocation2 + $0x18] sm:$0xff]  ;;  %v111_v8 = vld [vmem:[%s293_s2] sm:$0xff]  ;;  %s232_s2 = smov [#allocation5]  }
  0x16   :  { %115 = vperm.xlu0 %176, %v111_v8   ;;  %v166_v9 = vpack.c.bf16 %v36_v7, %v35_v5  ;;  %v32_v10 = vld [vmem:[%s291_s0] sm:$0xff]  ;;  %s135_s8 = sshll.u32 %s232_s2, 4  ;;  %s136_s8 = int_to_ptr.vmem [resolvable:$true] %s135_s8 }
  0x17   :  { %164 = vmatpush3.bf16.msra.mxu0 %v163_v6  ;;  %v145_v11 = vld [vmem:[%s294_s3] ss:$0 sm:$0xff]  ;;  %s199_s9 = scalar_lea.vmem %s136_s8, 128  ;;  %p204_p9 = scmp.lt.s32.totalorder %s136_s8, %s136_s8 }
  0x18   :  { %165 = vmatprep.subr.bf16.mxu0 %v228_v0  ;;  %p200_p8 = scmp.ne.s32.totalorder %s136_s8, %s199_s9  ;;  %p205_p10 = scmp.lt.s32.totalorder %s199_s9, %s199_s9 }
  0x1a   :  { %p206_p11 = por %p205_p10, %p204_p9 }
  0x1b   :  { %167 = vmatpush3.bf16.msra.mxu0 %v166_v9 }
  0x1c   :  { %p207_p12 = pnand %p206_p11, %p200_p8 }
  0x1e   :  { %160 = vmatmul.mubr.msk.f32.vlgmr.msra.gmra.mrb[0].mxu0 %vm37_vm1, %v32_v10 }
  0x95   :  { %v116_v12 = vpop.permute.xlu0 %115 }
  0x96   :  { %v124_v13 = vmul.f32 %v145_v11, %v116_v12 }
  0x98   :  { %v125_v14 = vmin.f32 %v124_v13, 1e+08 }
  0x9a   :  { %v126_v15 = vmul.f32 20.0, %v125_v14 }
  0xf1   :  { %v107_v16 = vpop.f32.mrb[0].mxu0 }
  0xf2   :  { %v127_v17 = vmul.f32 %v126_v15, %v107_v16  ;;  %v161_v18 = vpop.f32.mrb[1].mxu0 }
  0xf4   :  { %128 = vst [vmem:[#allocation5] sm:$0xff] %v127_v17 }
  0xf5   :  { %210 = shalt.err (!%p207_p12)
}
  0xf6   :  { %s211_s10 = scalar_lea.hbm %s295_s4, 128 }
  0xf7   :  { %p212_p13 = scmp.ne.s32.totalorder %s295_s4, %s211_s10  ;;  %p215_p0 = scmp.lt.u32.totalorder %s211_s10, %s295_s4 }
  0xf9   :  { %p217_p1 = pnand %p215_p0, %p212_p13 }
  0xfb   :  { %220 = shalt.err (!%p217_p1)
}
  0xfc   :  { %138 = dma.vmem_to_hbm [thread:$0]  %s136_s8, 128, %s295_s4, [#allocation4]  }
  0xfd   :  { %223 = dma.done.wait [#allocation4], 128  }
  0xfe   :  { %224 = vsyncadd [#allocation4], 4294967168 }
  0xff   :  { %142 = vsyncpa [#allocation3], 1 }
 0x100   :  { %143 = vsyncpa [#allocation4], 1 }

</bundles_post_ra>
